<compile_context>
chip_gen: v6e
topology: v6e:2x2x1
jax: 0.10.0
libtpu: 0.0.40
codegen_flags: <defaults>
</compile_context>

<pallas_src>
import jax
import jax.numpy as jnp
from jax.experimental import pallas as pl
from jax.experimental.pallas import tpu as pltpu


# ------------------------------ Pallas kernel -------------------------------
def _embed_fc_kernel(x_ref, w1_ref, b1_ref, w2_ref, b2_ref, o_ref):
    # x_ref: (tm, input_dim); w1: (input_dim, emb); w2: (emb, emb);
    # b1/b2: (1, emb); o_ref: (tm, emb). Whole MLP chain fused in-vreg.
    x = x_ref[...]
    h = jnp.dot(x, w1_ref[...], preferred_element_type=jnp.float32) + b1_ref[...]
    h = jax.nn.gelu(h, approximate=True)          # tanh-approx -> EUP slot
    o = jnp.dot(h, w2_ref[...], preferred_element_type=jnp.float32) + b2_ref[...]
    o_ref[...] = o.astype(o_ref.dtype)


def embed_fc_pallas(x, w1, b1, w2, b2):
    """x: (..., input_dim) (any leading dims, flattened like torch .view(-1, D));
    w1: (input_dim, emb); b1: (emb,); w2: (emb, emb); b2: (emb,).
    Returns (M, emb) with M = prod(leading dims)."""
    input_dim, emb_dim = w1.shape
    x2 = x.reshape(-1, input_dim).astype(jnp.float32)   # torch: x.view(-1, input_dim)
    M = x2.shape[0]

    b1r = b1.reshape(1, emb_dim).astype(jnp.float32)
    b2r = b2.reshape(1, emb_dim).astype(jnp.float32)
    w1 = w1.astype(jnp.float32)
    w2 = w2.astype(jnp.float32)

    # Block the flattened batch axis. Small M -> a single grid step (block
    # shape == full array extent, so no (8,128) divisibility constraint);
    # large M -> 512-row blocks (multiple of 8 sublanes), weights resident
    # across blocks via constant index_maps.
    tm = M if M <= 512 else 512
    grid = (pl.cdiv(M, tm),)

    out = pl.pallas_call(
        _embed_fc_kernel,
        out_shape=jax.ShapeDtypeStruct((M, emb_dim), jnp.float32),
        grid_spec=pltpu.PrefetchScalarGridSpec(
            num_scalar_prefetch=0,
            grid=grid,
            in_specs=[
                pl.BlockSpec((tm, input_dim), lambda i: (i, 0)),        # x block
                pl.BlockSpec((input_dim, emb_dim), lambda i: (0, 0)),   # W1 (resident)
                pl.BlockSpec((1, emb_dim), lambda i: (0, 0)),           # b1 (lane-dense)
                pl.BlockSpec((emb_dim, emb_dim), lambda i: (0, 0)),     # W2 (resident)
                pl.BlockSpec((1, emb_dim), lambda i: (0, 0)),           # b2 (lane-dense)
            ],
            out_specs=pl.BlockSpec((tm, emb_dim), lambda i: (i, 0)),
        ),
        compiler_params=pltpu.CompilerParams(
            dimension_semantics=("parallel",)),   # v7x: shard M blocks across TCs
    )(x2, w1, b1r, w2, b2r)
    return out


# ------------------------------- driver --------------------------------------
if __name__ == "__main__":
    # Shapes implied by the diffusion script's usage of EmbedFC:
    # class-embedding branch, input_dim = n_classes, emb_dim = n_feat.
    # Leading dims (2, 4) exercise the .view(-1, input_dim) flatten -> M = 8,
    # which exactly fills a vreg's 8 sublanes; emb_dim = 128 is lane-dense.
    input_dim = 10
    emb_dim = 128

    key = jax.random.PRNGKey(0)
    k_x, k_w1, k_b1, k_w2, k_b2 = jax.random.split(key, 5)

    x = jax.random.normal(k_x, (2, 4, input_dim), dtype=jnp.float32)
    w1 = 0.1 * jax.random.normal(k_w1, (input_dim, emb_dim), dtype=jnp.float32)
    b1 = 0.1 * jax.random.normal(k_b1, (emb_dim,), dtype=jnp.float32)
    w2 = 0.1 * jax.random.normal(k_w2, (emb_dim, emb_dim), dtype=jnp.float32)
    b2 = 0.1 * jax.random.normal(k_b2, (emb_dim,), dtype=jnp.float32)

    out = embed_fc_pallas(x, w1, b1, w2, b2)
    out = jax.block_until_ready(out)

    # pure-JAX reference (same tanh-approx GELU as the kernel)
    x2 = x.reshape(-1, input_dim)
    h_ref = jax.nn.gelu(x2 @ w1 + b1[None, :], approximate=True)
    out_ref = h_ref @ w2 + b2[None, :]

    assert out.shape == (8, emb_dim), out.shape
    assert jnp.allclose(out, out_ref, rtol=1e-5, atol=1e-5), (
        float(jnp.max(jnp.abs(out - out_ref))))
    print("KERNEL_OK")
</pallas_src>

<mosaic_0001>
module attributes {stable_mosaic.version = 11 : i64} {
  func.func @_embed_fc_kernel(%arg0: i32, %arg1: memref<8x10xf32, #tpu.memory_space<vmem>>, %arg2: memref<10x128xf32, #tpu.memory_space<vmem>>, %arg3: memref<1x128xf32, #tpu.memory_space<vmem>>, %arg4: memref<128x128xf32, #tpu.memory_space<vmem>>, %arg5: memref<1x128xf32, #tpu.memory_space<vmem>>, %arg6: memref<8x128xf32, #tpu.memory_space<vmem>>) attributes {dimension_semantics = [#tpu.dimension_semantics<parallel>], iteration_bounds = array<i64: 1>, scalar_prefetch = 0 : i64, scratch_operands = 0 : i64, tpu.core_type = #tpu.core_type<tc>, window_params = [{transform_indices = @transform_0, window_bounds = array<i64: 8, 10>}, {pipeline_mode = #tpu.pipeline_mode<synchronous>, transform_indices = @transform_1, window_bounds = array<i64: 10, 128>}, {pipeline_mode = #tpu.pipeline_mode<synchronous>, transform_indices = @transform_2, window_bounds = array<i64: 1, 128>}, {pipeline_mode = #tpu.pipeline_mode<synchronous>, transform_indices = @transform_3, window_bounds = array<i64: 128, 128>}, {pipeline_mode = #tpu.pipeline_mode<synchronous>, transform_indices = @transform_4, window_bounds = array<i64: 1, 128>}, {transform_indices = @transform_5, window_bounds = array<i64: 8, 128>}]} {
    %c0 = arith.constant 0 : index
    %c0_0 = arith.constant 0 : index
    %0 = vector.load %arg1[%c0, %c0_0] : memref<8x10xf32, #tpu.memory_space<vmem>>, vector<8x10xf32>
    %c0_1 = arith.constant 0 : index
    %c0_2 = arith.constant 0 : index
    %1 = vector.load %arg2[%c0_1, %c0_2] : memref<10x128xf32, #tpu.memory_space<vmem>>, vector<10x128xf32>
    %cst = arith.constant dense<0.000000e+00> : vector<8x128xf32>
    %2 = tpu.matmul %0, %1, %cst {dimension_numbers = #tpu.dot_dimension_numbers<[1], [0], [0], [1], [0, 0, 1, 1], [], []>} : vector<8x10xf32>, vector<10x128xf32>, vector<8x128xf32> -> vector<8x128xf32>
    %c0_3 = arith.constant 0 : index
    %c0_4 = arith.constant 0 : index
    %3 = vector.load %arg3[%c0_3, %c0_4] : memref<1x128xf32, #tpu.memory_space<vmem>>, vector<1x128xf32>
    %4 = vector.broadcast %3 : vector<1x128xf32> to vector<8x128xf32>
    %5 = arith.addf %2, %4 : vector<8x128xf32>
    %6 = arith.mulf %5, %5 : vector<8x128xf32>
    %7 = arith.mulf %5, %6 : vector<8x128xf32>
    %cst_5 = arith.constant 4.471500e-02 : f32
    %8 = vector.broadcast %cst_5 : f32 to vector<8x128xf32>
    %9 = arith.mulf %8, %7 : vector<8x128xf32>
    %10 = arith.addf %5, %9 : vector<8x128xf32>
    %cst_6 = arith.constant 0.797884583 : f32
    %11 = vector.broadcast %cst_6 : f32 to vector<8x128xf32>
    %12 = arith.mulf %11, %10 : vector<8x128xf32>
    %13 = math.tanh %12 : vector<8x128xf32>
    %cst_7 = arith.constant 1.000000e+00 : f32
    %14 = vector.broadcast %cst_7 : f32 to vector<8x128xf32>
    %15 = arith.addf %14, %13 : vector<8x128xf32>
    %cst_8 = arith.constant 5.000000e-01 : f32
    %16 = vector.broadcast %cst_8 : f32 to vector<8x128xf32>
    %17 = arith.mulf %16, %15 : vector<8x128xf32>
    %18 = arith.mulf %5, %17 : vector<8x128xf32>
    %c0_9 = arith.constant 0 : index
    %c0_10 = arith.constant 0 : index
    %19 = vector.load %arg4[%c0_9, %c0_10] : memref<128x128xf32, #tpu.memory_space<vmem>>, vector<128x128xf32>
    %cst_11 = arith.constant dense<0.000000e+00> : vector<8x128xf32>
    %20 = tpu.matmul %18, %19, %cst_11 {dimension_numbers = #tpu.dot_dimension_numbers<[1], [0], [0], [1], [0, 0, 1, 1], [], []>} : vector<8x128xf32>, vector<128x128xf32>, vector<8x128xf32> -> vector<8x128xf32>
    %c0_12 = arith.constant 0 : index
    %c0_13 = arith.constant 0 : index
    %21 = vector.load %arg5[%c0_12, %c0_13] : memref<1x128xf32, #tpu.memory_space<vmem>>, vector<1x128xf32>
    %22 = vector.broadcast %21 : vector<1x128xf32> to vector<8x128xf32>
    %23 = arith.addf %20, %22 : vector<8x128xf32>
    %c0_14 = arith.constant 0 : index
    %c0_15 = arith.constant 0 : index
    %24 = vector.load %arg6[%c0_14, %c0_15] : memref<8x128xf32, #tpu.memory_space<vmem>>, vector<8x128xf32>
    tpu.vector_store %arg6[%c0_14, %c0_15], %23 {strides = array<i32>} : memref<8x128xf32, #tpu.memory_space<vmem>>, vector<8x128xf32>,
    return
  }
  func.func @transform_0(%arg0: i32) -> (i32, i32) {
    %c0_i32 = arith.constant 0 : i32
    %c0_i32_0 = arith.constant 0 : i32
    return %arg0, %c0_i32 : i32, i32
  }
  func.func @transform_1(%arg0: i32) -> (i32, i32) {
    %c0_i32 = arith.constant 0 : i32
    %c0_i32_0 = arith.constant 0 : i32
    %c0_i32_1 = arith.constant 0 : i32
    return %c0_i32, %c0_i32_0 : i32, i32
  }
  func.func @transform_2(%arg0: i32) -> (i32, i32) {
    %c0_i32 = arith.constant 0 : i32
    %c0_i32_0 = arith.constant 0 : i32
    %c0_i32_1 = arith.constant 0 : i32
    return %c0_i32, %c0_i32_0 : i32, i32
  }
  func.func @transform_3(%arg0: i32) -> (i32, i32) {
    %c0_i32 = arith.constant 0 : i32
    %c0_i32_0 = arith.constant 0 : i32
    %c0_i32_1 = arith.constant 0 : i32
    return %c0_i32, %c0_i32_0 : i32, i32
  }
  func.func @transform_4(%arg0: i32) -> (i32, i32) {
    %c0_i32 = arith.constant 0 : i32
    %c0_i32_0 = arith.constant 0 : i32
    %c0_i32_1 = arith.constant 0 : i32
    return %c0_i32, %c0_i32_0 : i32, i32
  }
  func.func @transform_5(%arg0: i32) -> (i32, i32) {
    %c0_i32 = arith.constant 0 : i32
    %c0_i32_0 = arith.constant 0 : i32
    return %arg0, %c0_i32 : i32, i32
  }
}

</mosaic_0001>

<bundles_post_ra>
// kernel: tpu_custom_call.1
= control target key start
LH: loop header
LB: loop body
LE: loop exit
PB: predicated region body
PF: predicated region fallthrough
CT: control target
= control target key end

     0   :  { %10 = vsyncpa [#allocation3], 0  ;;  %s485_s0 = inlined_call_operand.hbm [shape: f32[8,10], index: 0, kind: input, shape index: {}]   ;;  %s486_s1 = inlined_call_operand.hbm [shape: f32[10,128], index: 1, kind: input, shape index: {}]   ;;  %s487_s2 = inlined_call_operand.vmem [shape: f32[1,128], index: 2, kind: input, shape index: {}]   ;;  %s488_s3 = inlined_call_operand.hbm [shape: f32[128,128], index: 3, kind: input, shape index: {}]   ;;  %s489_s4 = inlined_call_operand.vmem [shape: f32[1,128], index: 4, kind: input, shape index: {}]   ;;  %s490_s5 = inlined_call_operand.hbm [shape: f32[8,128], index: 5, kind: output, shape index: {}]  }
   0x1   :  { %11 = vsyncpa [#allocation6], 0 }
   0x2   :  { %12 = vsyncpa [#allocation4], 0  ;;  %s429_s18 = smov [#allocation5]  }
   0x3   :  { %s28_s19 = sshll.u32 %s429_s18, 4  ;;  %s29_s19 = int_to_ptr.vmem [resolvable:$true] %s28_s19 }
   0x4   :  { %s351_s20 = scalar_lea.vmem %s29_s19, 256  ;;  %p356_p1 = scmp.lt.s32.totalorder %s29_s19, %s29_s19 }
   0x5   :  { %p352_p0 = scmp.ne.s32.totalorder %s29_s19, %s351_s20  ;;  %p357_p2 = scmp.lt.s32.totalorder %s351_s20, %s351_s20 }
   0x7   :  { %p358_p3 = por %p357_p2, %p356_p1 }
   0x9   :  { %p359_p4 = pnand %p358_p3, %p352_p0 }
   0xb   :  { %362 = shalt.err (!%p359_p4)
}
   0xc   :  { %s430_s21 = smov 128   ;;  %s431_s22 = smov 8  }
   0xd   :  { %34 = dma.hbm_to_vmem [thread:$0]  %s486_s1, 256, %s29_s19, [#allocation6], %s430_s21, %s430_s21, %s431_s22  }
   0xe   :  { %s432_s25 = smov [#allocation2]   ;;  %s433_s27 = smov [#allocation7]  }
   0xf   :  { %s19_s26 = sshll.u32 %s432_s25, 4  ;;  %s42_s28 = sshll.u32 %s433_s27, 4  ;;  %s20_s26 = int_to_ptr.vmem [resolvable:$true] %s19_s26  ;;  %s43_s28 = int_to_ptr.vmem [resolvable:$true] %s42_s28 }
  0x10   :  { %s371_s29 = scalar_lea.vmem %s20_s26, 128  ;;  %p376_p6 = scmp.lt.s32.totalorder %s20_s26, %s20_s26 }
  0x11   :  { %p372_p5 = scmp.ne.s32.totalorder %s20_s26, %s371_s29  ;;  %p377_p7 = scmp.lt.s32.totalorder %s371_s29, %s371_s29 }
  0x13   :  { %p378_p8 = por %p377_p7, %p376_p6 }
  0x15   :  { %p379_p9 = pnand %p378_p8, %p372_p5 }
  0x17   :  { %382 = shalt.err (!%p379_p9)
}
  0x18   :  { %22 = dma.hbm_to_vmem [thread:$0]  %s485_s0, 128, %s20_s26, [#allocation3]  }
  0x19   :  { %s391_s7 = scalar_lea.vmem %s43_s28, 2048  ;;  %p396_p11 = scmp.lt.s32.totalorder %s43_s28, %s43_s28 }
  0x1a   :  { %p392_p10 = scmp.ne.s32.totalorder %s43_s28, %s391_s7  ;;  %p397_p12 = scmp.lt.s32.totalorder %s391_s7, %s391_s7 }
  0x1c   :  { %p398_p13 = por %p397_p12, %p396_p11 }
  0x1e   :  { %p399_p0 = pnand %p398_p13, %p392_p10 }
  0x20   :  { %402 = shalt.err (!%p399_p0)
}
  0x21   :  { %48 = dma.hbm_to_vmem [thread:$0]  %s488_s3, 2048, %s43_s28, [#allocation6], %s430_s21, %s430_s21, %s431_s22  }
  0x22   :  { %423 = dma.done.wait [#allocation3], 128  }
  0x23   :  { %424 = vsyncadd [#allocation3], 4294967168 }
  0x24   :  { %425 = dma.done.wait [#allocation6], 2304  }
  0x25   :  { %426 = vsyncadd [#allocation6], 4294964992  ;;  %v434_v0 = vmov 0.0   ;;  %vm435_vm0 = vmmov 0   ;;  %vm74_vm1 = vcmask 1041408   ;;  %v61_v2 = vld [vmem:[#allocation5] sm:$0xff] }
  0x26   :  { %291 = vmatprep.subr.mxu0 %v434_v0  ;;  %295 = vmatprep.mubr.msk.f32.mxu0 %vm435_vm0, %v434_v0  ;;  %v62_v1 = vld [vmem:[#allocation5 + $0x8] sm:$0x3]  ;;  %v60_v3 = vld [vmem:[#allocation2] sm:$0xff]  ;;  %vm70_vm2 = vcmask 80896   ;;  %v171_v5 = vld [vmem:[#allocation7 + $0x70] sm:$0xff]  ;;  %s436_s11 = smov [#allocation8]  }
  0x27   :  { %298 = vmatprep.subr.mxu1 %v434_v0  ;;  %330 = vmatprep.mubr.msk.f32.mxu1 %vm435_vm0, %v434_v0  ;;  %v172_v4 = vld [vmem:[#allocation7 + $0x78] sm:$0xff]  ;;  %v170_v6 = vld [vmem:[#allocation7 + $0x68] sm:$0xff]  ;;  %v169_v7 = vld [vmem:[#allocation7 + $0x60] sm:$0xff] }
  0x28   :  { %292 = vmatpush3.msk.msra.mxu0 %vm74_vm1, %v62_v1  ;;  %299 = vmatpush3.msra.mxu1 %v172_v4  ;;  %v168_v8 = vld [vmem:[#allocation7 + $0x58] sm:$0xff]  ;;  %v167_v9 = vld [vmem:[#allocation7 + $0x50] sm:$0xff]  ;;  %v166_v10 = vld [vmem:[#allocation7 + $0x48] sm:$0xff] }
  0x29   :  { %293 = vmatprep.subr.mxu0 %v434_v0  ;;  %300 = vmatprep.subr.mxu1 %v434_v0  ;;  %v165_v11 = vld [vmem:[#allocation7 + $0x40] sm:$0xff]  ;;  %v164_v12 = vld [vmem:[#allocation7 + $0x38] sm:$0xff]  ;;  %v163_v13 = vld [vmem:[#allocation7 + $0x30] sm:$0xff] }
  0x2a   :  { %294 = vmatpush3.msra.mxu0 %v61_v2  ;;  %301 = vmatpush3.msra.mxu1 %v171_v5  ;;  %v162_v14 = vld [vmem:[#allocation7 + $0x28] sm:$0xff]  ;;  %v161_v15 = vld [vmem:[#allocation7 + $0x20] sm:$0xff]  ;;  %v160_v16 = vld [vmem:[#allocation7 + $0x18] sm:$0xff] }
  0x2b   :  { %296 = vmatmul.mubr.msk.f32.vlgmr.msra.gmra.mxu0 %vm70_vm2, %v60_v3  ;;  %302 = vmatprep.subr.mxu1 %v434_v0  ;;  %v159_v17 = vld [vmem:[#allocation7 + $0x10] sm:$0xff]  ;;  %v158_v18 = vld [vmem:[#allocation7 + $0x8] sm:$0xff]  ;;  %v157_v19 = vld [vmem:[#allocation7] sm:$0xff] }
  0x2c   :  { %303 = vmatpush3.msra.mxu1 %v170_v6  ;;  %v267_v20 = vld [vmem:[%s487_s2] ss:$0 sm:$0xff]  ;;  %s257_s2 = sshll.u32 %s436_s11, 4  ;;  %s258_s2 = int_to_ptr.vmem [resolvable:$true] %s257_s2 }
  0x2d   :  { %304 = vmatprep.subr.mxu1 %v434_v0  ;;  %v270_v33 = vld [vmem:[%s489_s4] ss:$0 sm:$0xff]  ;;  %s403_s12 = scalar_lea.vmem %s258_s2, 128  ;;  %p408_p2 = scmp.lt.s32.totalorder %s258_s2, %s258_s2 }
  0x2e   :  { %305 = vmatpush3.msra.mxu1 %v169_v7  ;;  %p404_p1 = scmp.ne.s32.totalorder %s258_s2, %s403_s12  ;;  %p409_p3 = scmp.lt.s32.totalorder %s403_s12, %s403_s12 }
  0x2f   :  { %306 = vmatprep.subr.mxu1 %v434_v0 }
  0x30   :  { %307 = vmatpush3.msra.mxu1 %v168_v8  ;;  %p410_p4 = por %p409_p3, %p408_p2 }
  0x31   :  { %308 = vmatprep.subr.mxu1 %v434_v0 }
  0x32   :  { %309 = vmatpush3.msra.mxu1 %v167_v9  ;;  %p411_p5 = pnand %p410_p4, %p404_p1 }
  0x33   :  { %310 = vmatprep.subr.mxu1 %v434_v0 }
  0x34   :  { %311 = vmatpush3.msra.mxu1 %v166_v10 }
  0x35   :  { %312 = vmatprep.subr.mxu1 %v434_v0 }
  0x36   :  { %313 = vmatpush3.msra.mxu1 %v165_v11 }
  0x37   :  { %314 = vmatprep.subr.mxu1 %v434_v0 }
  0x38   :  { %315 = vmatpush3.msra.mxu1 %v164_v12 }
  0x39   :  { %316 = vmatprep.subr.mxu1 %v434_v0 }
  0x3a   :  { %317 = vmatpush3.msra.mxu1 %v163_v13 }
  0x3b   :  { %318 = vmatprep.subr.mxu1 %v434_v0 }
  0x3c   :  { %319 = vmatpush3.msra.mxu1 %v162_v14 }
  0x3d   :  { %320 = vmatprep.subr.mxu1 %v434_v0 }
  0x3e   :  { %321 = vmatpush3.msra.mxu1 %v161_v15 }
  0x3f   :  { %322 = vmatprep.subr.mxu1 %v434_v0 }
  0x40   :  { %323 = vmatpush3.msra.mxu1 %v160_v16 }
  0x41   :  { %324 = vmatprep.subr.mxu1 %v434_v0 }
  0x42   :  { %325 = vmatpush3.msra.mxu1 %v159_v17 }
  0x43   :  { %326 = vmatprep.subr.mxu1 %v434_v0 }
  0x44   :  { %327 = vmatpush3.msra.mxu1 %v158_v18 }
  0x45   :  { %328 = vmatprep.subr.mxu1 %v434_v0 }
  0x46   :  { %329 = vmatpush3.msra.mxu1 %v157_v19 }
  0xeb   :  { %v144_v21 = vpop.f32.mrf.mxu0 }
  0xec   :  { %v145_v22 = vadd.f32 %v267_v20, %v144_v21 }
  0xed   :  { %v297_v23 = vpop.f32.mrf.mxu0 }
  0xee   :  { %v148_v24 = vmul.f32 %v145_v22, %v145_v22 }
  0xf0   :  { %v149_v25 = vmul.f32 %v148_v24, %v145_v22 }
  0xf2   :  { %v150_v26 = vmul.f32 0.044715, %v149_v25 }
  0xf4   :  { %v151_v27 = vadd.f32 %v150_v26, %v145_v22 }
  0xf6   :  { %v152_v28 = vmul.f32 0.7978846, %v151_v27 }
  0xf8   :  { %341 = vtanh.f32 %v152_v28 }
 0x105   :  { %v342_v29 = vpop.eup %341 }
 0x106   :  { %v154_v30 = vadd.f32 1.0, %v342_v29 }
 0x108   :  { %v155_v31 = vmul.f32 0.5, %v154_v30 }
 0x10a   :  { %v156_v32 = vmul.f32 %v155_v31, %v145_v22 }
 0x10c   :  { %331 = vmatmul.mubr.f32.vlgmr.msra.gmra.mxu1 %v156_v32 }
 0x1cc   :  { %v246_v34 = vpop.f32.mrf.mxu1 }
 0x1cd   :  { %v247_v35 = vadd.f32 %v270_v33, %v246_v34 }
 0x1ce   :  { %v332_v36 = vpop.f32.mrf.mxu1 }
 0x1cf   :  { %250 = vst [vmem:[#allocation8] sm:$0xff] %v247_v35 }
 0x1d0   :  { %414 = shalt.err (!%p411_p5)
}
 0x1d1   :  { %260 = dma.vmem_to_hbm [thread:$0]  %s258_s2, 128, %s490_s5, [#allocation4]  }
 0x1d2   :  { %427 = dma.done.wait [#allocation4], 128  }
 0x1d3   :  { %428 = vsyncadd [#allocation4], 4294967168 }
 0x1d4   :  { %264 = vsyncpa [#allocation3], 1 }
 0x1d5   :  { %265 = vsyncpa [#allocation6], 1 }
 0x1d6   :  { %266 = vsyncpa [#allocation4], 1 }

</bundles_post_ra>
